<compile_context>
chip_gen: v7x
topology: tpu7x:2x2x1
jax: 0.10.0
libtpu: 0.0.40
codegen_flags: <defaults>
</compile_context>

<pallas_src>
import functools

import jax
import jax.numpy as jnp
from jax.experimental import pallas as pl
from jax.experimental.pallas import tpu as pltpu

C_PAD = 128  # lane-dense padded width for the output / w2 / packed-parameter slab


def classifier_kernel(x_ref, w1_ref, w2_ref, pb_ref, out_ref,
                      m_sc, l_sc, attn_sc, max_sc, sum_sc, *, seq_len):
    s_idx = pl.program_id(1)
    n_s = pl.num_programs(1)

    x_nat = x_ref[...]                           # (Bt, St, E), DMA dtype (f32 or bf16)
    xt = x_nat.astype(jnp.float32)               # f32 for VPU/EUP math (v5e: no bf16 VPU)
    Bt, St, E = xt.shape
    H = w1_ref.shape[1]

    @pl.when(s_idx == 0)
    def _init():
        m_sc[...] = jnp.full_like(m_sc, -jnp.inf)
        l_sc[...] = jnp.zeros_like(l_sc)
        attn_sc[...] = jnp.zeros_like(attn_sc)
        max_sc[...] = jnp.full_like(max_sc, -jnp.inf)
        sum_sc[...] = jnp.zeros_like(sum_sc)

    # AttentionWeightedAverage scores.  The Linear(E, 1) bias is the same scalar at
    # every position, so it cancels exactly in softmax(dim=1) and is dropped.
    attn_w = pb_ref[0:1, :E]                                  # (1, E)
    scores = jnp.sum(xt * attn_w[None, :, :], axis=-1)        # (Bt, St)

    # Online (flash-style) softmax statistics across S tiles.
    m_old = m_sc[...]                                         # (Bt, 1)
    m_new = jnp.maximum(m_old, jnp.max(scores, axis=1, keepdims=True))
    alpha = jnp.exp(m_old - m_new)                            # (Bt, 1)
    p = jnp.exp(scores - m_new)                               # (Bt, St)

    # One MXU contraction over S: rows = [softmax numerator ; uniform (avg) weights].
    w_stack = jnp.concatenate([p[:, None, :], jnp.ones_like(p)[:, None, :]], axis=1)
    pooled = jnp.einsum("bks,bse->bke", w_stack.astype(x_nat.dtype), x_nat,
                        preferred_element_type=jnp.float32)   # (Bt, 2, E)

    m_sc[...] = m_new
    l_sc[...] = alpha * l_sc[...] + jnp.sum(p, axis=1, keepdims=True)
    attn_sc[...] = alpha * attn_sc[...] + pooled[:, 0, :]
    sum_sc[...] = sum_sc[...] + pooled[:, 1, :]
    max_sc[...] = jnp.maximum(max_sc[...], jnp.max(xt, axis=1))

    @pl.when(s_idx == n_s - 1)
    def _finalize():
        last = xt[:, St - 1, :]                               # true last timestep
        avg_pool = sum_sc[...] * (1.0 / seq_len)
        attn_pool = attn_sc[...] * pl.reciprocal(l_sc[...], approx=True)   # EUP slot
        cat = jnp.concatenate([last, max_sc[...], avg_pool, attn_pool], axis=-1)  # (Bt,4E)

        # dense1: single MXU push with K = 4E; dense2: MXU push against lane-dense w2.
        h = jnp.dot(cat, w1_ref[...], preferred_element_type=jnp.float32) \
            + pb_ref[1:2, :H]
        h = jnp.maximum(h, 0.0)                               # ReLU
        out = jnp.dot(h, w2_ref[...], preferred_element_type=jnp.float32) \
            + pb_ref[2:3, :]
        out_ref[...] = out.astype(out_ref.dtype)


def _largest_divisor_tile(dim, unit, max_elems):
    """Largest multiple of `unit` that divides `dim` and is <= max_elems, else `dim`."""
    best = None
    d = unit
    while d <= min(dim, max_elems):
        if dim % d == 0:
            best = d
        d += unit
    return best if best is not None else dim


def classifier_forward(x, params, *, compute_dtype=None, b_tile=None, s_tile=None):
    B, S, E = x.shape
    H = params["w1"].shape[1]
    C = params["w2"].shape[1]

    if compute_dtype is not None:
        x = x.astype(compute_dtype)   # bf16 x halves HBM traffic; accumulation stays f32
    itemsize = int(jnp.dtype(x.dtype).itemsize)

    # Tile selection.  Batch axis is megacore-parallel; S axis is the sequential
    # online-softmax reduction.  Keep the double-buffered x tile well inside the
    # tightest scoped-VMEM budget (v7x: 64 MiB physical / 32 MiB default scoped).
    if b_tile is None:
        b_tile = _largest_divisor_tile(B, 8, 64)
    if s_tile is None:
        per_row_bytes = max(b_tile * E * itemsize, 1)
        max_rows = max(8, (8 << 20) // per_row_bytes)          # ~8 MiB per x buffer
        s_tile = _largest_divisor_tile(S, 8, max_rows)
    assert B % b_tile == 0 and S % s_tile == 0
    n_b, n_s = B // b_tile, S // s_tile

    # Parameter packing (done once per weight set in practice): w2 padded to lane-dense
    # (H, 128); attn_w / b1 / b2 packed into one (3, 128) slab (4 input DMAs, not 7).
    w2_pad = jnp.zeros((H, C_PAD), jnp.float32).at[:, :C].set(params["w2"])
    packed = jnp.zeros((3, C_PAD), jnp.float32)
    packed = packed.at[0, :E].set(params["attn_w"][0])
    packed = packed.at[1, :H].set(params["b1"][0])
    packed = packed.at[2, :C].set(params["b2"][0])

    x_tile_bytes = b_tile * s_tile * E * itemsize
    w_bytes = 4 * (4 * E * H + H * C_PAD + 3 * C_PAD)
    scratch_bytes = 4 * b_tile * (3 * E + 2)
    out_bytes = 4 * b_tile * C_PAD
    vmem_limit = int(2 * x_tile_bytes + 2 * w_bytes + 2 * out_bytes + scratch_bytes
                     + (4 << 20))
    vmem_limit = max(vmem_limit, 16 << 20)

    flops = B * (2 * S * E            # attention scores
                 + 2 * 2 * S * E      # MXU pooled contraction (attn + avg)
                 + 2 * 4 * E * H      # dense1
                 + 2 * H * C_PAD)     # dense2
    bytes_accessed = int(B * S * E * itemsize + w_bytes + B * C_PAD * 4)

    grid_spec = pltpu.PrefetchScalarGridSpec(
        num_scalar_prefetch=0,
        grid=(n_b, n_s),
        in_specs=[
            pl.BlockSpec((b_tile, s_tile, E), lambda b, s: (b, s, 0)),
            pl.BlockSpec((4 * E, H), lambda b, s: (0, 0)),     # VMEM-resident weights
            pl.BlockSpec((H, C_PAD), lambda b, s: (0, 0)),
            pl.BlockSpec((3, C_PAD), lambda b, s: (0, 0)),
        ],
        out_specs=pl.BlockSpec((b_tile, C_PAD), lambda b, s: (b, 0)),
        scratch_shapes=[
            pltpu.VMEM((b_tile, 1), jnp.float32),   # running softmax max
            pltpu.VMEM((b_tile, 1), jnp.float32),   # running softmax denominator
            pltpu.VMEM((b_tile, E), jnp.float32),   # attention-pool numerator
            pltpu.VMEM((b_tile, E), jnp.float32),   # running max pool
            pltpu.VMEM((b_tile, E), jnp.float32),   # running sum (avg pool)
        ],
    )

    out = pl.pallas_call(
        functools.partial(classifier_kernel, seq_len=S),
        out_shape=jax.ShapeDtypeStruct((B, C_PAD), jnp.float32),
        grid_spec=grid_spec,
        compiler_params=pltpu.CompilerParams(
            dimension_semantics=("parallel", "arbitrary"),
            vmem_limit_bytes=vmem_limit),
        cost_estimate=pl.CostEstimate(flops=int(flops),
                                      transcendentals=int(B * S + B),
                                      bytes_accessed=bytes_accessed),
    )(x, params["w1"], w2_pad, packed)
    return out[:, :C]


def reference_forward(x, p):
    # Pure-JAX reference of the eval-mode PyTorch forward (keeps attn bias; it cancels).
    max_pool = jnp.max(x, axis=1)
    avg_pool = jnp.mean(x, axis=1)
    scores = jnp.einsum("bse,e->bs", x, p["attn_w"][0]) + p["attn_b"][0, 0]
    w = jax.nn.softmax(scores, axis=1)
    attn = jnp.einsum("bse,bs->be", x, w)
    last = x[:, -1, :]
    cat = jnp.concatenate([last, max_pool, avg_pool, attn], axis=1)
    h = jax.nn.relu(cat @ p["w1"] + p["b1"][0])
    return h @ p["w2"] + p["b2"][0]


def make_params(key, embedding_dim, hidden_dim, num_classes):
    k = jax.random.split(key, 6)
    s = 0.1
    return {
        # nn.Linear(embedding_dim, 1) of AttentionWeightedAverage
        "attn_w": jax.random.normal(k[0], (1, embedding_dim), jnp.float32) * s,
        "attn_b": jax.random.normal(k[1], (1, 1), jnp.float32) * s,
        # nn.Linear(4E, H)  (stored as (in, out) so the kernel does x @ W)
        "w1": jax.random.normal(k[2], (4 * embedding_dim, hidden_dim), jnp.float32) * s,
        "b1": jax.random.normal(k[3], (1, hidden_dim), jnp.float32) * s,
        # nn.Linear(H, C)
        "w2": jax.random.normal(k[4], (hidden_dim, num_classes), jnp.float32) * s,
        "b2": jax.random.normal(k[5], (1, num_classes), jnp.float32) * s,
    }


if __name__ == "__main__":
    B, S = 2, 16
    embedding_dim, hidden_dim, num_classes = 32, 32, 4

    key = jax.random.PRNGKey(0)
    kx, kp = jax.random.split(key)
    x = jax.random.normal(kx, (B, S, embedding_dim), jnp.float32)
    params = make_params(kp, embedding_dim, hidden_dim, num_classes)

    ref = reference_forward(x, params)

    # f32 data path, S tiled in two steps so the online-softmax accumulation across
    # grid iterations is exercised (tolerance covers the EUP approx reciprocal).
    out = jax.block_until_ready(classifier_forward(x, params, s_tile=8))
    assert out.shape == (B, num_classes)
    assert jnp.allclose(out, ref, atol=2e-3, rtol=2e-3), (out, ref)

    # bf16 x data path (halves HBM traffic and VMEM tile footprint; f32 accumulation).
    out_bf16 = jax.block_until_ready(
        classifier_forward(x, params, compute_dtype=jnp.bfloat16))
    assert out_bf16.shape == (B, num_classes)
    assert jnp.allclose(out_bf16, ref, atol=1e-1, rtol=1e-1), (out_bf16, ref)

    print("KERNEL_OK")
</pallas_src>

<mosaic_0001>
module attributes {stable_mosaic.version = 11 : i64} {
  func.func @classifier_kernel(%arg0: i32, %arg1: i32, %arg2: memref<2x8x32xf32, #tpu.memory_space<vmem>>, %arg3: memref<128x32xf32, #tpu.memory_space<vmem>>, %arg4: memref<32x128xf32, #tpu.memory_space<vmem>>, %arg5: memref<3x128xf32, #tpu.memory_space<vmem>>, %arg6: memref<2x128xf32, #tpu.memory_space<vmem>>, %arg7: memref<2x1xf32, #tpu.memory_space<vmem>>, %arg8: memref<2x1xf32, #tpu.memory_space<vmem>>, %arg9: memref<2x32xf32, #tpu.memory_space<vmem>>, %arg10: memref<2x32xf32, #tpu.memory_space<vmem>>, %arg11: memref<2x32xf32, #tpu.memory_space<vmem>>) attributes {dimension_semantics = [#tpu.dimension_semantics<parallel>, #tpu.dimension_semantics<arbitrary>], iteration_bounds = array<i64: 1, 2>, scalar_prefetch = 0 : i64, scratch_operands = 5 : i64, tpu.core_type = #tpu.core_type<tc>, window_params = [{transform_indices = @transform_0, window_bounds = array<i64: 2, 8, 32>}, {pipeline_mode = #tpu.pipeline_mode<synchronous>, transform_indices = @transform_1, window_bounds = array<i64: 128, 32>}, {pipeline_mode = #tpu.pipeline_mode<synchronous>, transform_indices = @transform_2, window_bounds = array<i64: 32, 128>}, {pipeline_mode = #tpu.pipeline_mode<synchronous>, transform_indices = @transform_3, window_bounds = array<i64: 3, 128>}, {transform_indices = @transform_4, window_bounds = array<i64: 2, 128>}]} {
    %c0 = arith.constant 0 : index
    %c0_0 = arith.constant 0 : index
    %c0_1 = arith.constant 0 : index
    %0 = vector.load %arg2[%c0, %c0_0, %c0_1] : memref<2x8x32xf32, #tpu.memory_space<vmem>>, vector<2x8x32xf32>
    %c0_i32 = arith.constant 0 : i32
    %1 = arith.cmpi eq, %arg1, %c0_i32 : i32
    %2 = arith.extui %1 : i1 to i32
    %c0_i32_2 = arith.constant 0 : i32
    %3 = arith.cmpi ne, %2, %c0_i32_2 : i32
    scf.if %3 {
      %cst_31 = arith.constant 0xFF800000 : f32
      %49 = vector.broadcast %cst_31 : f32 to vector<2x1xf32>
      %c0_32 = arith.constant 0 : index
      %c0_33 = arith.constant 0 : index
      %50 = vector.load %arg7[%c0_32, %c0_33] : memref<2x1xf32, #tpu.memory_space<vmem>>, vector<2x1xf32>
      tpu.vector_store %arg7[%c0_32, %c0_33], %49 {strides = array<i32>} : memref<2x1xf32, #tpu.memory_space<vmem>>, vector<2x1xf32>,
      %cst_34 = arith.constant 0.000000e+00 : f32
      %51 = vector.broadcast %cst_34 : f32 to vector<2x1xf32>
      %c0_35 = arith.constant 0 : index
      %c0_36 = arith.constant 0 : index
      %52 = vector.load %arg8[%c0_35, %c0_36] : memref<2x1xf32, #tpu.memory_space<vmem>>, vector<2x1xf32>
      tpu.vector_store %arg8[%c0_35, %c0_36], %51 {strides = array<i32>} : memref<2x1xf32, #tpu.memory_space<vmem>>, vector<2x1xf32>,
      %cst_37 = arith.constant 0.000000e+00 : f32
      %53 = vector.broadcast %cst_37 : f32 to vector<2x32xf32>
      %c0_38 = arith.constant 0 : index
      %c0_39 = arith.constant 0 : index
      %54 = vector.load %arg9[%c0_38, %c0_39] : memref<2x32xf32, #tpu.memory_space<vmem>>, vector<2x32xf32>
      tpu.vector_store %arg9[%c0_38, %c0_39], %53 {strides = array<i32>} : memref<2x32xf32, #tpu.memory_space<vmem>>, vector<2x32xf32>,
      %cst_40 = arith.constant 0xFF800000 : f32
      %55 = vector.broadcast %cst_40 : f32 to vector<2x32xf32>
      %c0_41 = arith.constant 0 : index
      %c0_42 = arith.constant 0 : index
      %56 = vector.load %arg10[%c0_41, %c0_42] : memref<2x32xf32, #tpu.memory_space<vmem>>, vector<2x32xf32>
      tpu.vector_store %arg10[%c0_41, %c0_42], %55 {strides = array<i32>} : memref<2x32xf32, #tpu.memory_space<vmem>>, vector<2x32xf32>,
      %cst_43 = arith.constant 0.000000e+00 : f32
      %57 = vector.broadcast %cst_43 : f32 to vector<2x32xf32>
      %c0_44 = arith.constant 0 : index
      %c0_45 = arith.constant 0 : index
      %58 = vector.load %arg11[%c0_44, %c0_45] : memref<2x32xf32, #tpu.memory_space<vmem>>, vector<2x32xf32>
      tpu.vector_store %arg11[%c0_44, %c0_45], %57 {strides = array<i32>} : memref<2x32xf32, #tpu.memory_space<vmem>>, vector<2x32xf32>,
    } else {
    }
    %c0_3 = arith.constant 0 : index
    %c0_4 = arith.constant 0 : index
    %4 = vector.load %arg5[%c0_3, %c0_4] : memref<3x128xf32, #tpu.memory_space<vmem>>, vector<1x32xf32>
    %5 = vector.shape_cast %4 : vector<1x32xf32> to vector<1x1x32xf32>
    %6 = vector.broadcast %5 : vector<1x1x32xf32> to vector<2x8x32xf32>
    %7 = arith.mulf %0, %6 : vector<2x8x32xf32>
    %cst = arith.constant dense<0.000000e+00> : vector<2x8xf32>
    %8 = vector.multi_reduction <add>, %7, %cst [2] : vector<2x8x32xf32> to vector<2x8xf32>
    %c0_5 = arith.constant 0 : index
    %c0_6 = arith.constant 0 : index
    %9 = vector.load %arg7[%c0_5, %c0_6] : memref<2x1xf32, #tpu.memory_space<vmem>>, vector<2x1xf32>
    %cst_7 = arith.constant dense<0xFF800000> : vector<2xf32>
    %10 = vector.multi_reduction <maximumf>, %8, %cst_7 [1] : vector<2x8xf32> to vector<2xf32>
    %11 = vector.shape_cast %10 : vector<2xf32> to vector<2x1xf32>
    %12 = arith.maximumf %9, %11 : vector<2x1xf32>
    %13 = arith.subf %9, %12 : vector<2x1xf32>
    %14 = math.exp %13 : vector<2x1xf32>
    %15 = vector.broadcast %12 : vector<2x1xf32> to vector<2x8xf32>
    %16 = arith.subf %8, %15 : vector<2x8xf32>
    %17 = math.exp %16 : vector<2x8xf32>
    %18 = vector.shape_cast %17 : vector<2x8xf32> to vector<2x1x8xf32>
    %cst_8 = arith.constant 1.000000e+00 : f32
    %19 = vector.broadcast %cst_8 : f32 to vector<2x8xf32>
    %20 = vector.shape_cast %19 : vector<2x8xf32> to vector<2x1x8xf32>
    %21 = tpu.concatenate %18, %20 in 1 : vector<2x1x8xf32>, vector<2x1x8xf32> -> vector<2x2x8xf32>
    "tpu.trace_start"() <{level = 10 : i32, message = "bks,bse->bke"}> : () -> ()
    %cst_9 = arith.constant dense<0.000000e+00> : vector<2x2x32xf32>
    %22 = tpu.matmul %21, %0, %cst_9 {dimension_numbers = #tpu.dot_dimension_numbers<[2], [1], [1], [2], [0, 0, 0, 1, 1, 2], [0], [0]>} : vector<2x2x8xf32>, vector<2x8x32xf32>, vector<2x2x32xf32> -> vector<2x2x32xf32>
    "tpu.trace_stop"() : () -> ()
    %c0_10 = arith.constant 0 : index
    %c0_11 = arith.constant 0 : index
    %23 = vector.load %arg7[%c0_10, %c0_11] : memref<2x1xf32, #tpu.memory_space<vmem>>, vector<2x1xf32>
    tpu.vector_store %arg7[%c0_10, %c0_11], %12 {strides = array<i32>} : memref<2x1xf32, #tpu.memory_space<vmem>>, vector<2x1xf32>,
    %c0_12 = arith.constant 0 : index
    %c0_13 = arith.constant 0 : index
    %24 = vector.load %arg8[%c0_12, %c0_13] : memref<2x1xf32, #tpu.memory_space<vmem>>, vector<2x1xf32>
    %25 = arith.mulf %14, %24 : vector<2x1xf32>
    %cst_14 = arith.constant dense<0.000000e+00> : vector<2xf32>
    %26 = vector.multi_reduction <add>, %17, %cst_14 [1] : vector<2x8xf32> to vector<2xf32>
    %27 = vector.shape_cast %26 : vector<2xf32> to vector<2x1xf32>
    %28 = arith.addf %25, %27 : vector<2x1xf32>
    %c0_15 = arith.constant 0 : index
    %c0_16 = arith.constant 0 : index
    %29 = vector.load %arg8[%c0_15, %c0_16] : memref<2x1xf32, #tpu.memory_space<vmem>>, vector<2x1xf32>
    tpu.vector_store %arg8[%c0_15, %c0_16], %28 {strides = array<i32>} : memref<2x1xf32, #tpu.memory_space<vmem>>, vector<2x1xf32>,
    %c0_17 = arith.constant 0 : index
    %c0_18 = arith.constant 0 : index
    %30 = vector.load %arg9[%c0_17, %c0_18] : memref<2x32xf32, #tpu.memory_space<vmem>>, vector<2x32xf32>
    %31 = vector.broadcast %14 : vector<2x1xf32> to vector<2x32xf32>
    %32 = arith.mulf %31, %30 : vector<2x32xf32>
    %33 = vector.extract_strided_slice %22 {offsets = [0, 0, 0], sizes = [2, 1, 32], strides = [1, 1, 1]} : vector<2x2x32xf32> to vector<2x1x32xf32>
    %34 = vector.shape_cast %33 : vector<2x1x32xf32> to vector<2x32xf32>
    %35 = arith.addf %32, %34 : vector<2x32xf32>
    %c0_19 = arith.constant 0 : index
    %c0_20 = arith.constant 0 : index
    %36 = vector.load %arg9[%c0_19, %c0_20] : memref<2x32xf32, #tpu.memory_space<vmem>>, vector<2x32xf32>
    tpu.vector_store %arg9[%c0_19, %c0_20], %35 {strides = array<i32>} : memref<2x32xf32, #tpu.memory_space<vmem>>, vector<2x32xf32>,
    %c0_21 = arith.constant 0 : index
    %c0_22 = arith.constant 0 : index
    %37 = vector.load %arg11[%c0_21, %c0_22] : memref<2x32xf32, #tpu.memory_space<vmem>>, vector<2x32xf32>
    %38 = vector.extract_strided_slice %22 {offsets = [0, 1, 0], sizes = [2, 1, 32], strides = [1, 1, 1]} : vector<2x2x32xf32> to vector<2x1x32xf32>
    %39 = vector.shape_cast %38 : vector<2x1x32xf32> to vector<2x32xf32>
    %40 = arith.addf %37, %39 : vector<2x32xf32>
    %c0_23 = arith.constant 0 : index
    %c0_24 = arith.constant 0 : index
    %41 = vector.load %arg11[%c0_23, %c0_24] : memref<2x32xf32, #tpu.memory_space<vmem>>, vector<2x32xf32>
    tpu.vector_store %arg11[%c0_23, %c0_24], %40 {strides = array<i32>} : memref<2x32xf32, #tpu.memory_space<vmem>>, vector<2x32xf32>,
    %c0_25 = arith.constant 0 : index
    %c0_26 = arith.constant 0 : index
    %42 = vector.load %arg10[%c0_25, %c0_26] : memref<2x32xf32, #tpu.memory_space<vmem>>, vector<2x32xf32>
    %cst_27 = arith.constant dense<0xFF800000> : vector<2x32xf32>
    %43 = vector.multi_reduction <maximumf>, %0, %cst_27 [1] : vector<2x8x32xf32> to vector<2x32xf32>
    %44 = arith.maximumf %42, %43 : vector<2x32xf32>
    %c0_28 = arith.constant 0 : index
    %c0_29 = arith.constant 0 : index
    %45 = vector.load %arg10[%c0_28, %c0_29] : memref<2x32xf32, #tpu.memory_space<vmem>>, vector<2x32xf32>
    tpu.vector_store %arg10[%c0_28, %c0_29], %44 {strides = array<i32>} : memref<2x32xf32, #tpu.memory_space<vmem>>, vector<2x32xf32>,
    %c1_i32 = arith.constant 1 : i32
    %46 = arith.cmpi eq, %arg1, %c1_i32 : i32
    %47 = arith.extui %46 : i1 to i32
    %c0_i32_30 = arith.constant 0 : i32
    %48 = arith.cmpi ne, %47, %c0_i32_30 : i32
    scf.if %48 {
      %49 = vector.extract_strided_slice %0 {offsets = [0, 7, 0], sizes = [2, 1, 32], strides = [1, 1, 1]} : vector<2x8x32xf32> to vector<2x1x32xf32>
      %50 = vector.shape_cast %49 : vector<2x1x32xf32> to vector<2x32xf32>
      %c0_31 = arith.constant 0 : index
      %c0_32 = arith.constant 0 : index
      %51 = vector.load %arg11[%c0_31, %c0_32] : memref<2x32xf32, #tpu.memory_space<vmem>>, vector<2x32xf32>
      %cst_33 = arith.constant 6.250000e-02 : f32
      %52 = vector.broadcast %cst_33 : f32 to vector<2x32xf32>
      %53 = arith.mulf %51, %52 : vector<2x32xf32>
      %c0_34 = arith.constant 0 : index
      %c0_35 = arith.constant 0 : index
      %54 = vector.load %arg9[%c0_34, %c0_35] : memref<2x32xf32, #tpu.memory_space<vmem>>, vector<2x32xf32>
      %c0_36 = arith.constant 0 : index
      %c0_37 = arith.constant 0 : index
      %55 = vector.load %arg8[%c0_36, %c0_37] : memref<2x1xf32, #tpu.memory_space<vmem>>, vector<2x1xf32>
      %56 = tpu.reciprocal %55 {approx = true} : vector<2x1xf32> -> vector<2x1xf32>
      %57 = vector.broadcast %56 : vector<2x1xf32> to vector<2x32xf32>
      %58 = arith.mulf %54, %57 : vector<2x32xf32>
      %c0_38 = arith.constant 0 : index
      %c0_39 = arith.constant 0 : index
      %59 = vector.load %arg10[%c0_38, %c0_39] : memref<2x32xf32, #tpu.memory_space<vmem>>, vector<2x32xf32>
      %60 = tpu.concatenate %50, %59, %53, %58 in 1 : vector<2x32xf32>, vector<2x32xf32>, vector<2x32xf32>, vector<2x32xf32> -> vector<2x128xf32>
      %c0_40 = arith.constant 0 : index
      %c0_41 = arith.constant 0 : index
      %61 = vector.load %arg3[%c0_40, %c0_41] : memref<128x32xf32, #tpu.memory_space<vmem>>, vector<128x32xf32>
      %cst_42 = arith.constant dense<0.000000e+00> : vector<2x32xf32>
      %62 = tpu.matmul %60, %61, %cst_42 {dimension_numbers = #tpu.dot_dimension_numbers<[1], [0], [0], [1], [0, 0, 1, 1], [], []>} : vector<2x128xf32>, vector<128x32xf32>, vector<2x32xf32> -> vector<2x32xf32>
      %c1 = arith.constant 1 : index
      %c0_43 = arith.constant 0 : index
      %63 = vector.load %arg5[%c1, %c0_43] : memref<3x128xf32, #tpu.memory_space<vmem>>, vector<1x32xf32>
      %64 = vector.broadcast %63 : vector<1x32xf32> to vector<2x32xf32>
      %65 = arith.addf %62, %64 : vector<2x32xf32>
      %cst_44 = arith.constant 0.000000e+00 : f32
      %66 = vector.broadcast %cst_44 : f32 to vector<2x32xf32>
      %67 = arith.maximumf %65, %66 : vector<2x32xf32>
      %c0_45 = arith.constant 0 : index
      %c0_46 = arith.constant 0 : index
      %68 = vector.load %arg4[%c0_45, %c0_46] : memref<32x128xf32, #tpu.memory_space<vmem>>, vector<32x128xf32>
      %cst_47 = arith.constant dense<0.000000e+00> : vector<2x128xf32>
      %69 = tpu.matmul %67, %68, %cst_47 {dimension_numbers = #tpu.dot_dimension_numbers<[1], [0], [0], [1], [0, 0, 1, 1], [], []>} : vector<2x32xf32>, vector<32x128xf32>, vector<2x128xf32> -> vector<2x128xf32>
      %c2 = arith.constant 2 : index
      %c0_48 = arith.constant 0 : index
      %70 = vector.load %arg5[%c2, %c0_48] : memref<3x128xf32, #tpu.memory_space<vmem>>, vector<1x128xf32>
      %71 = vector.broadcast %70 : vector<1x128xf32> to vector<2x128xf32>
      %72 = arith.addf %69, %71 : vector<2x128xf32>
      %c0_49 = arith.constant 0 : index
      %c0_50 = arith.constant 0 : index
      %73 = vector.load %arg6[%c0_49, %c0_50] : memref<2x128xf32, #tpu.memory_space<vmem>>, vector<2x128xf32>
      tpu.vector_store %arg6[%c0_49, %c0_50], %72 {strides = array<i32>} : memref<2x128xf32, #tpu.memory_space<vmem>>, vector<2x128xf32>,
    } else {
    }
    return
  }
  func.func @transform_0(%arg0: i32, %arg1: i32) -> (i32, i32, i32) {
    %c0_i32 = arith.constant 0 : i32
    %c0_i32_0 = arith.constant 0 : i32
    return %arg0, %arg1, %c0_i32 : i32, i32, i32
  }
  func.func @transform_1(%arg0: i32, %arg1: i32) -> (i32, i32) {
    %c0_i32 = arith.constant 0 : i32
    %c0_i32_0 = arith.constant 0 : i32
    %c0_i32_1 = arith.constant 0 : i32
    return %c0_i32, %c0_i32_0 : i32, i32
  }
  func.func @transform_2(%arg0: i32, %arg1: i32) -> (i32, i32) {
    %c0_i32 = arith.constant 0 : i32
    %c0_i32_0 = arith.constant 0 : i32
    %c0_i32_1 = arith.constant 0 : i32
    return %c0_i32, %c0_i32_0 : i32, i32
  }
  func.func @transform_3(%arg0: i32, %arg1: i32) -> (i32, i32) {
    %c0_i32 = arith.constant 0 : i32
    %c0_i32_0 = arith.constant 0 : i32
    %c0_i32_1 = arith.constant 0 : i32
    return %c0_i32, %c0_i32_0 : i32, i32
  }
  func.func @transform_4(%arg0: i32, %arg1: i32) -> (i32, i32) {
    %c0_i32 = arith.constant 0 : i32
    %c0_i32_0 = arith.constant 0 : i32
    return %arg0, %c0_i32 : i32, i32
  }
}

</mosaic_0001>

<bundles_post_ra>
// kernel: tpu_custom_call.1
= control target key start
LH: loop header
LB: loop body
LE: loop exit
PB: predicated region body
PF: predicated region fallthrough
CT: control target
= control target key end

     0   :  { %9 = vsyncpa [#allocation9], 0  ;;  %s1138_s15 = smov 0   ;;  %s1140_s16 = smov 0   ;;  %s1333_s0 = inlined_call_operand.vmem [shape: f32[2,16,32], index: 0, kind: input, shape index: {}]   ;;  %s1334_s1 = inlined_call_operand.vmem [shape: f32[128,32], index: 1, kind: input, shape index: {}]   ;;  %s1335_s2 = inlined_call_operand.vmem [shape: f32[32,128], index: 2, kind: input, shape index: {}]   ;;  %s1336_s3 = inlined_call_operand.vmem [shape: f32[3,128], index: 3, kind: input, shape index: {}]   ;;  %s1337_s4 = inlined_call_operand.hbm [shape: f32[2,128], index: 4, kind: output, shape index: {}]  }
   0x1   :  { %s1142_s17 = smov 0   ;;  %s1144_s18 = smov 0  }
   0x2   :  { %s1146_s19 = smov 0  }
   0x3 LB: > { %s829_s20 = sadd.s32 4294967295, %s1098_s19   ;;  %s24_s21 = sadd.s32 1, %s1094_s18  ;;  %s1098_s19 = sphi %s1146_s19, %s15_s19   ;;  %s1094_s18 = sphi %s1144_s18, %s1342_s18   ;;  %s1090_s17 = sphi %s1142_s17, %s1341_s17   ;;  %s1086_s16 = sphi %s1140_s16, %s1340_s16   ;;  %s1082_s15 = sphi %s1138_s15, %s1339_s15  }
   0x4   : > { %p25_p0 = scmp.ge.s32.totalorder %s24_s21, 2  ;;  %p43_p1 = scmp.ne.s32.totalorder %s1086_s16, %s1082_s15 }
   0x5   : > { %p44_p2 = scmp.eq.s32.totalorder %s1098_s19, 0  ;;  %s36_s23 = sadd.s32 1, %s1086_s16 }
   0x6   : > { %s1344_s21 = smov (%p25_p0, %s24_s21), 0  ;;  %p831_p5 = scmp.ge.s32.totalorder %s1098_s19, 2 }
   0x7   : > { %p45_p3 = por %p44_p2, %p43_p1  ;;  %s32_s22 = ssub.s32 %s1094_s18, %s1344_s21 }
   0x8   : > { %p34_p4 = scmp.eq.s32.totalorder %s32_s22, 0  ;;  %167 = sbr.rel (%p831_p5) target bundleno = 22 (0x16), region = 28 }
   0xa   : > { %s1174_s24 = scalar_select %p34_p4, %s1086_s16, %s36_s23  }
   0xf   : > { %170 = sbr.rel (!%p45_p3) target bundleno = 22 (0x16), region = 32  ;;  %s172_s25 = sand.u32 (%p45_p3), 1, %s1086_s16  }
  0x10   : > { %s833_s26 = sshll.u32 (%p45_p3), %s1094_s18, 3  ;;  %s832_s27 = sshll.u32 (%p45_p3), %s172_s25, 4 }
  0x11   : > { %s179_s30 = scalar_lea.vmem (%p45_p3), %s1333_s0, %s833_s26  ;;  %s174_s5 = scalar_lea.vmem (%p45_p3), [#allocation7], %s832_s27 }
  0x12   : > { %v209_v0 = vld [vmem:[%s179_s30] sm:$0xff] (%p45_p3)  ;;  %v211_v1 = vld [vmem:[%s179_s30 + $0x10] sm:$0xff] (%p45_p3) }
  0x13   : > { %210 = vst [vmem:[%s174_s5] sm:$0xff] (%p45_p3), %v209_v0  ;;  %212 = vst [vmem:[%s174_s5 + $0x8] sm:$0xff] (%p45_p3), %v211_v1 }
  0x16 PF: > { %p834_p6 = scmp.ge.s32.totalorder %s1098_s19, 1  ;;  %p217_p7 = scmp.lt.s32.totalorder %s1098_s19, 3 }
  0x18   : > { %p218_p8 = pnand %p834_p6, %p217_p7 }
  0x19   : > { %s224_s6 = sand.u32 (!%p218_p8), 1, %s1082_s15   ;;  %p836_p9 = scmp.ne.s32.totalorder (!%p218_p8), %s1090_s17, 0 }
  0x1a   : > { %221 = sbr.rel (%p218_p8) target bundleno = 1486 (0x5ce), region = 70  ;;  %s835_s7 = sshll.u32 (!%p218_p8), %s224_s6, 4 }
  0x1b   : > { %s226_s8 = scalar_lea.vmem (!%p218_p8), [#allocation7], %s835_s7 }
  0x1c   : > { %v1185_v2 = vld [vmem:[%s226_s8] sm:$0xff] (!%p218_p8)  ;;  %v1187_v3 = vld [vmem:[%s226_s8 + $0x8] sm:$0xff] (!%p218_p8) }
  0x21   : > { %250 = sbr.rel (%p836_p9) target bundleno = 40 (0x28), region = 78  ;;  %vm251_vm0 = vcmask (!%p836_p9), 1024   ;;  %vm254_vm1 = vcmask (!%p836_p9), 254976   ;;  %v1100_v4 = vmov (!%p836_p9), -inf   ;;  %v1101_v5 = vmov (!%p836_p9), 0.0  }
  0x22   : > { %252 = vst.msk [vmem:[#allocation2] sm:$0x3] (!%p836_p9), %vm251_vm0, %v1100_v4  ;;  %253 = vst.msk [vmem:[#allocation3] sm:$0x3] (!%p836_p9), %vm251_vm0, %v1101_v5 }
  0x23   : > { %255 = vst.msk [vmem:[#allocation4] sm:$0x3] (!%p836_p9), %vm254_vm1, %v1101_v5  ;;  %256 = vst.msk [vmem:[#allocation5] sm:$0x3] (!%p836_p9), %vm254_vm1, %v1100_v4 }
  0x24   : > { %257 = vst.msk [vmem:[#allocation6] sm:$0x3] (!%p836_p9), %vm254_vm1, %v1101_v5 }
  0x28 PF: > { %v837_v6 = vld [vmem:[%s1336_s3] ss:$0 sm:$0xff]  ;;  %vm265_vm2 = vcmask 261120   ;;  %v275_v11 = vlaneseq  ;;  %vm285_vm3 = vcmask 1041409   ;;  %vm288_vm4 = vcmask 58368   ;;  %p840_p10 = scmp.ne.s32.totalorder %s1090_s17, 1 }
  0x29   : > { %v263_v7 = vmul.f32 %v837_v6, %v1185_v2  ;;  %v264_v8 = vmul.f32 %v837_v6, %v1187_v3  ;;  %v1102_v21 = vmov 0   ;;  %v272_v22 = vld [vmem:[#allocation2] sm:$0x3]  ;;  %vm484_vm5 = vcmask 1024   ;;  %v486_v1 = vld [vmem:[#allocation3] sm:$0x3] }
  0x2a   : > { %v276_v12 = vand.u32 127, %v275_v11  ;;  %v278_v13 = vshrl.u32 %v275_v11, 7  ;;  %1019 = vset.pattern.permute.xlu1 %v1102_v21  ;;  %1020 = vset.pattern.permute.xlu0 %v1102_v21  ;;  %v1103_v38 = vmov 0.0   ;;  %vm1104_vm6 = vmmov 0   ;;  %v516_v63 = vld [vmem:[#allocation5] sm:$0x3] }
  0x2b   : > { %v266_v9 = vsel %vm265_vm2, %v263_v7, 0.0  ;;  %v269_v10 = vsel %vm265_vm2, %v264_v8, 0.0  ;;  %874 = vmatprep.subr.mxu0 %v1103_v38  ;;  %879 = vmatprep.subr.mxu1 %v1103_v38  ;;  %vm334_vm7 = vcmask 1040384   ;;  %vm337_vm8 = vcmask 64512   ;;  %v495_v7 = vld [vmem:[#allocation4] sm:$0x3] }
  0x2c   : > { %267 = vadd.xlane.f32.xlu0 %v266_v9  ;;  %v279_v15 = vsub.s32 %v276_v12, %v278_v13  ;;  %v302_v26 = vsub.s32 0, %v278_v13  ;;  %v306_v27 = vsub.s32 1, %v278_v13  ;;  %875 = vmatpush3.msra.mxu0 %v1185_v2  ;;  %v517_v48 = vsel %vm265_vm2, %v1185_v2, -inf  ;;  %v510_v12 = vld [vmem:[#allocation6] sm:$0x3]  ;;  %s1106_s11 = smov (!%p840_p10), 64  }
  0x2d   : > { %876 = vmatprep.mubr.msk.f32.mxu0 %vm1104_vm6, %v1103_v38  ;;  %880 = vmatpush3.msra.mxu1 %v1187_v3  ;;  %v524_v49 = vsel %vm265_vm2, %v1187_v3, -inf  ;;  %v518_v50 = vrot.slane %v517_v48, 4  ;;  %vm508_vm9 = vcmask 254976   ;;  %s1107_s12 = smov (!%p840_p10), 32   ;;  %vm1109_vm10 = vmmov (!%p840_p10), 0   ;;  %s1111_s9 = smov (!%p840_p10), 96  }
  0x2e   : > { %881 = vmatprep.mubr.msk.f32.mxu1 %vm1104_vm6, %v1103_v38  ;;  %v525_v51 = vrot.slane %v524_v49, 4  ;;  %vm575_vm11 = vcmask (!%p840_p10), 523264   ;;  %vm578_vm12 = vcmask (!%p840_p10), 785408  }
  0x2f   : > { %v519_v52 = vmax.f32 %v517_v48, %v518_v50  ;;  %v593_v48 = vld [vmem:[%s1334_s1 + $0x60] sm:$0xff] (!%p840_p10) }
  0x30   : > { %270 = vadd.xlane.f32.xlu0 %v269_v10  ;;  %v526_v53 = vmax.f32 %v524_v49, %v525_v51  ;;  %v594_v49 = vld [vmem:[%s1334_s1 + $0x68] sm:$0xff] (!%p840_p10)  ;;  %v595_v51 = vld [vmem:[%s1334_s1 + $0x70] sm:$0xff] (!%p840_p10) }
  0x31   : > { %v520_v54 = vrot.slane %v519_v52, 2  ;;  %v949_v50 = vpack.c.bf16 (!%p840_p10), %v594_v49, %v593_v48 }
  0x32   : > { %v527_v55 = vrot.slane %v526_v53, 2 }
  0x33   : > { %v521_v56 = vmax.f32 %v519_v52, %v520_v54  ;;  %v596_v52 = vld [vmem:[%s1334_s1 + $0x78] sm:$0xff] (!%p840_p10)  ;;  %v1110_v54 = vmov (!%p840_p10), 0.0  }
  0x34   : > { %v528_v57 = vmax.f32 %v526_v53, %v527_v55  ;;  %v952_v53 = vpack.c.bf16 (!%p840_p10), %v596_v52, %v595_v51  ;;  %v679_v55 = vld [vmem:[%s1335_s2] sm:$0xff] (!%p840_p10) }
  0x35   : > { %v522_v58 = vrot.slane %v521_v56, 1 }
  0x36   : > { %v529_v59 = vrot.slane %v528_v57, 1 }
  0x37   : > { %v523_v60 = vmax.f32 %v521_v56, %v522_v58  ;;  %v680_v56 = vld [vmem:[%s1335_s2 + $0x8] sm:$0xff] (!%p840_p10) }
  0x38   : > { %v530_v61 = vmax.f32 %v528_v57, %v529_v59  ;;  %v955_v57 = vpack.c.bf16 (!%p840_p10), %v680_v56, %v679_v55 }
  0x3a   : > { %v533_v62 = vsel %vm285_vm3, %v530_v61, %v523_v60 }
  0x3b   : > { %v535_v0 = vmax.f32 %v516_v63, %v533_v62  ;;  %v555_v62 = vrot.slane (!%p840_p10), %v1187_v3, 7  ;;  %v681_v3 = vld [vmem:[%s1335_s2 + $0x10] sm:$0xff] (!%p840_p10) }
  0x3d   : > { %536 = vst.msk [vmem:[#allocation5] sm:$0x3] %vm508_vm9, %v535_v0 }
  0xb9   : > { %v268_v14 = vpop.xlane.xlu0 %267 }
  0xba   : > { %v280_v17 = vrot.slane %v268_v14, %v279_v15 }
  0xbd   : > { %v271_v16 = vpop.xlane.xlu0 %270 }
  0xbe   : > { %v284_v18 = vrot.slane %v271_v16, %v279_v15 }
  0xc0   : > { %v286_v19 = vsel %vm285_vm3, %v284_v18, %v280_v17 }
  0xc1   : > { %v289_v20 = vsel %vm288_vm4, %v286_v19, -inf }
  0xc2   : > { %290 = vmax.xlane.f32.xlu1 %v289_v20 }
 0x14f   : > { %v291_v23 = vpop.xlane.xlu1 %290 }
 0x150   : > { %v292_v24 = vmax.f32 %v272_v22, %v291_v23 }
 0x152   : > { %v293_v25 = vsub.f32 %v272_v22, %v292_v24  ;;  %485 = vst.msk [vmem:[#allocation2] sm:$0x3] %vm484_vm5, %v292_v24  ;;  %298 = vperm.xlu1 %1019, %v292_v24   ;;  %v1105_v22 = vmov (!%p840_p10), 0  }
 0x154   : > { %v294_v35 = vmul.f32 1.442695, %v293_v25  ;;  %v552_v25 = vld [vmem:[#allocation5] sm:$0x3] (!%p840_p10) }
 0x1d1   : > { %v299_v28 = vpop.permute.xlu1 %298 }
 0x1d2   : > { %v303_v29 = vrot.slane %v299_v28, %v302_v26  ;;  %v307_v30 = vrot.slane %v299_v28, %v306_v27  ;;  %v559_v28 = vrot.slane (!%p840_p10), %v552_v25, 1 }
 0x1d4   : > { %v310_v31 = vsub.f32 %v268_v14, %v303_v29  ;;  %v311_v32 = vsub.f32 %v271_v16, %v307_v30  ;;  %v581_v29 = vld [vmem:[%s1334_s1] sm:$0xff] (!%p840_p10)  ;;  %v582_v30 = vld [vmem:[%s1334_s1 + $0x8] sm:$0xff] (!%p840_p10) }
 0x1d6   : > { %v312_v33 = vmul.f32 1.442695, %v310_v31  ;;  %v314_v34 = vmul.f32 1.442695, %v311_v32  ;;  %v583_v31 = vld [vmem:[%s1334_s1 + $0x10] sm:$0xff] (!%p840_p10)  ;;  %v1108_v32 = vmov (!%p840_p10), 0.0|0.0  }
 0x1d7   : > { %930 = vmatprep.subr.bf16.mxu0 (!%p840_p10), %v1108_v32  ;;  %954 = vmatprep.subr.bf16.mxu1 (!%p840_p10), %v1108_v32 }
 0x1d8   : > { %1021 = vpow2.f32 %v312_v33  ;;  %v931_v33 = vpack.c.bf16 (!%p840_p10), %v582_v30, %v581_v29 }
 0x1d9   : > { %1023 = vpow2.f32 %v314_v34  ;;  %v584_v34 = vld [vmem:[%s1334_s1 + $0x18] sm:$0xff] (!%p840_p10) }
 0x1da   : > { %1025 = vpow2.f32 %v294_v35  ;;  %v934_v35 = vpack.c.bf16 (!%p840_p10), %v584_v34, %v583_v31 }
 0x1e2   : > { %v1022_v36 = vpop.eup %1021 }
 0x1e3   : > { %v1024_v37 = vpop.eup %1023  ;;  %319 = vperm.xlu0 %1020, %v1022_v36   ;;  %v585_v36 = vld [vmem:[%s1334_s1 + $0x20] sm:$0xff] (!%p840_p10) }
 0x1e4   : > { %322 = vperm.xlu1 %1019, %v1024_v37   ;;  %v1026_v39 = vpop.eup %1025  ;;  %v586_v37 = vld [vmem:[%s1334_s1 + $0x28] sm:$0xff] (!%p840_p10) }
 0x1e5   : > { %v487_v4 = vmul.f32 %v1026_v39, %v486_v1  ;;  %v937_v38 = vpack.c.bf16 (!%p840_p10), %v586_v37, %v585_v36 }
 0x1e7   : > { %498 = vperm.xlu0 %1020, %v1026_v39   ;;  %v587_v39 = vld [vmem:[%s1334_s1 + $0x30] sm:$0xff] (!%p840_p10) }
 0x1eb   : > { %1027 = vset.pattern.permute.xlu0 (!%p840_p10), %v1105_v22 }
 0x262   : > { %v320_v40 = vpop.permute.xlu0 %319 }
 0x263   : > { %v323_v41 = vpop.permute.xlu1 %322  ;;  %v327_v42 = vrot.slane %v320_v40, %v279_v15  ;;  %v588_v40 = vld [vmem:[%s1334_s1 + $0x38] sm:$0xff] (!%p840_p10) }
 0x264   : > { %v331_v43 = vrot.slane %v323_v41, %v279_v15  ;;  %v940_v41 = vpack.c.bf16 (!%p840_p10), %v588_v40, %v587_v39 }
 0x265   : > { %v335_v44 = vsel %vm334_vm7, %v327_v42, 1.0 }
 0x266   : > { %v336_v45 = vsel %vm334_vm7, %v331_v43, 1.0  ;;  %877 = vmatmul.mubr.msk.f32.vlgmr.msra.gmra.mrb[0].mxu0 %vm337_vm8, %v335_v44  ;;  %v488_v46 = vsel %vm285_vm3, %v331_v43, %v327_v42  ;;  %v499_v8 = vpop.permute.xlu0 %498  ;;  %v589_v42 = vld [vmem:[%s1334_s1 + $0x40] sm:$0xff] (!%p840_p10)  ;;  %v590_v43 = vld [vmem:[%s1334_s1 + $0x48] sm:$0xff] (!%p840_p10) }
 0x267   : > { %882 = vmatmul.mubr.msk.f32.vlgmr.msra.gmra.mrb[0].mxu1 %vm337_vm8, %v336_v45  ;;  %v490_v47 = vsel %vm288_vm4, %v488_v46, 0.0  ;;  %v501_v16 = vmul.f32 %v499_v8, %v495_v7  ;;  %932 = vmatpush3.bf16.msra.mxu0 (!%p840_p10), %v931_v33  ;;  %v943_v44 = vpack.c.bf16 (!%p840_p10), %v590_v43, %v589_v42  ;;  %v591_v45 = vld [vmem:[%s1334_s1 + $0x50] sm:$0xff] (!%p840_p10)  ;;  %v592_v46 = vld [vmem:[%s1334_s1 + $0x58] sm:$0xff] (!%p840_p10) }
 0x268   : > { %491 = vadd.xlane.f32.xlu1 %v490_v47  ;;  %933 = vmatprep.subr.bf16.mxu0 (!%p840_p10), %v1108_v32  ;;  %v946_v47 = vpack.c.bf16 (!%p840_p10), %v592_v46, %v591_v45 }
 0x269   : > { %916 = vmatprep.mubr.msk.f32.mxu0 (!%p840_p10), %vm1109_vm10, %v1110_v54  ;;  %927 = vmatprep.mubr.msk.f32.mxu1 (!%p840_p10), %vm1109_vm10, %v1110_v54 }
 0x26a   : > { %956 = vmatpush3.bf16.msra.mxu1 (!%p840_p10), %v955_v57 }
 0x26b   : > { %935 = vmatpush3.bf16.msra.mxu0 (!%p840_p10), %v934_v35  ;;  %957 = vmatprep.subr.bf16.mxu1 (!%p840_p10), %v1108_v32 }
 0x26c   : > { %936 = vmatprep.subr.bf16.mxu0 (!%p840_p10), %v1108_v32 }
 0x26f   : > { %938 = vmatpush3.bf16.msra.mxu0 (!%p840_p10), %v937_v38 }
 0x270   : > { %939 = vmatprep.subr.bf16.mxu0 (!%p840_p10), %v1108_v32 }
 0x273   : > { %941 = vmatpush3.bf16.msra.mxu0 (!%p840_p10), %v940_v41 }
 0x274   : > { %942 = vmatprep.subr.bf16.mxu0 (!%p840_p10), %v1108_v32 }
 0x277   : > { %944 = vmatpush3.bf16.msra.mxu0 (!%p840_p10), %v943_v44 }
 0x278   : > { %945 = vmatprep.subr.bf16.mxu0 (!%p840_p10), %v1108_v32 }
 0x27b   : > { %947 = vmatpush3.bf16.msra.mxu0 (!%p840_p10), %v946_v47 }
 0x27c   : > { %948 = vmatprep.subr.bf16.mxu0 (!%p840_p10), %v1108_v32 }
 0x27f   : > { %950 = vmatpush3.bf16.msra.mxu0 (!%p840_p10), %v949_v50 }
 0x280   : > { %951 = vmatprep.subr.bf16.mxu0 (!%p840_p10), %v1108_v32 }
 0x283   : > { %953 = vmatpush3.bf16.msra.mxu0 (!%p840_p10), %v952_v53 }
 0x2f5   : > { %v492_v5 = vpop.xlane.xlu1 %491 }
 0x2f6   : > { %v493_v6 = vadd.f32 %v492_v5, %v487_v4 }
 0x2f8   : > { %494 = vst.msk [vmem:[#allocation3] sm:$0x3] %vm484_vm5, %v493_v6 }
 0x2ff   : > { %v544_v21 = vld [vmem:[#allocation3] sm:$0x3] (!%p840_p10) }
 0x300   : > { %1028 = vrcp.f32 (!%p840_p10), %v544_v21 }
 0x30a   : > { %v1029_v27 = vpop.eup (!%p840_p10), %1028 }
 0x30b   : > { %548 = vperm.xlu0 (!%p840_p10), %1027, %v1029_v27  }
 0x30f   : > { %560 = vrot.lane.b32.xlu0 (!%p840_p10), %v559_v28, %s1107_s12 }
 0x339   : > { %v407_v9 = vpop.f32.mrb[0].mxu0 }
 0x33a   : > { %v511_v10 = vrot.slane %v407_v9, 1  ;;  %v480_v11 = vpop.f32.mrb[0].mxu1  ;;  %v878_v13 = vpop.f32.mrb[1].mxu0  ;;  %540 = sbr.rel (%p840_p10) target bundleno = 1461 (0x5b5), region = 82 }
 0x33b   : > { %v504_v14 = vrot.slane %v480_v11, 7  ;;  %v883_v15 = vpop.f32.mrb[1].mxu1 }
 0x33c   : > { %v512_v17 = vsel %vm285_vm3, %v480_v11, %v511_v10 }
 0x33d   : > { %v505_v18 = vsel %vm285_vm3, %v504_v14, %v407_v9  ;;  %v514_v19 = vadd.f32 %v512_v17, %v510_v12  ;;  %v841_v14 = vld [vmem:[%s1336_s3 + $0x1] ss:$0 sm:$0xff] (!%p840_p10) }
 0x33e   : > { %v507_v20 = vadd.f32 %v505_v18, %v501_v16 }
 0x33f   : > { %515 = vst.msk [vmem:[#allocation6] sm:$0x3] %vm508_vm9, %v514_v19  ;;  %v842_v19 = vld [vmem:[%s1336_s3 + $0x2] ss:$0 sm:$0xff] (!%p840_p10) }
 0x340   : > { %509 = vst.msk [vmem:[#allocation4] sm:$0x3] %vm508_vm9, %v507_v20 }
 0x346   : > { %v541_v23 = vld [vmem:[#allocation6] sm:$0x3] }
 0x347   : > { %v542_v24 = vmul.f32 0.0625, %v541_v23  ;;  %v543_v58 = vld [vmem:[#allocation4] sm:$0x3] }
 0x349   : > { %v564_v26 = vrot.slane %v542_v24, 1 }
 0x34b   : > { %565 = vrot.lane.b32.xlu1 %v564_v26, %s1106_s11 }
 0x38a   : > { %v549_v59 = vpop.permute.xlu0 %548 }
 0x38b   : > { %v551_v60 = vmul.f32 %v549_v59, %v543_v58 }
 0x38d   : > { %v569_v61 = vrot.slane %v551_v60, 1 }
 0x38e   : > { %v561_v63 = vpop.permute.xlu0 %560 }
 0x38f   : > { %570 = vrot.lane.b32.xlu1 %v569_v61, %s1111_s9  ;;  %v573_v1 = vsel %vm265_vm2, %v1185_v2, %v561_v63  ;;  %v574_v4 = vsel %vm265_vm2, %v555_v62, %v561_v63  ;;  %v682_v2 = vld [vmem:[%s1335_s2 + $0x18] sm:$0xff] }
 0x390   : > { %v958_v13 = vpack.c.bf16 %v682_v2, %v681_v3 }
 0x392   : > { %959 = vmatpush3.bf16.msra.mxu1 %v958_v13 }
 0x3bd   : > { %v566_v0 = vpop.permute.xlu1 %565 }
 0x3be   : > { %v576_v5 = vsel %vm575_vm11, %v573_v1, %v566_v0  ;;  %v577_v6 = vsel %vm575_vm11, %v574_v4, %v566_v0 }
 0x401   : > { %v571_v7 = vpop.permute.xlu1 %570 }
 0x402   : > { %v579_v8 = vsel %vm578_vm12, %v576_v5, %v571_v7  ;;  %v580_v9 = vsel %vm578_vm12, %v577_v6, %v571_v7 }
 0x403   : > { %v604_v10 = vrot.slane %v579_v8, 7  ;;  %v605_v11 = vrot.slane %v580_v9, 7 }
 0x405   : > { %v606_v12 = vsel %vm334_vm7, %v604_v10, %v605_v11 }
 0x406   : > { %917 = vmatmul.mubr.f32.vlgmr.msra.gmra.mrb[0].mxu0 %v606_v12 }
 0x4d9   : > { %v674_v15 = vpop.f32.mrb[0].mxu0 }
 0x4da   : > { %v675_v16 = vadd.f32 %v841_v14, %v674_v15  ;;  %v918_v17 = vpop.f32.mrb[1].mxu0 }
 0x4dc   : > { %v678_v18 = vmax.f32 %v675_v16, 0.0 }
 0x4de   : > { %928 = vmatmul.mubr.msk.f32.vlgmr.msra.gmra.mrb[0].mxu1 %vm265_vm2, %v678_v18 }
 0x5b1   : > { %v757_v20 = vpop.f32.mrb[0].mxu1 }
 0x5b2   : > { %v758_v21 = vadd.f32 %v842_v19, %v757_v20  ;;  %v929_v22 = vpop.f32.mrb[1].mxu1 }
 0x5b4   : > { %761 = vst [vmem:[#allocation8] sm:$0x3] %v758_v21 }
 0x5b5 PF: > { %p1292_p11 = scmp.eq.s32.totalorder %s829_s20, 1  ;;  %s1112_s25 = smov [#allocation8]  }
 0x5b6   : > { %s771_s26 = sshll.u32 %s1112_s25, 4  ;;  %s772_s26 = int_to_ptr.vmem [resolvable:$true] %s771_s26 }
 0x5b7   : > { %s1030_s27 = scalar_lea.vmem %s772_s26, 32  ;;  %p1037_p1 = scmp.lt.s32.totalorder %s772_s26, %s772_s26 }
 0x5b8   : > { %p1031_p12 = scmp.ne.s32.totalorder %s772_s26, %s1030_s27  ;;  %p1038_p2 = scmp.lt.s32.totalorder %s1030_s27, %s1030_s27 }
 0x5ba   : > { %p1032_p13 = pnand %p1031_p12, %p1292_p11  ;;  %p1039_p3 = por %p1038_p2, %p1037_p1 }
 0x5bc   : > { %p1033_p0 = pneg %p1032_p13 }
 0x5be   : > { %p1040_p4 = pnand %p1039_p3, %p1033_p0 }
 0x5c0   : > { %1043 = shalt.err (!%p1040_p4)
}
 0x5c1   : > { %s1044_s20 = scalar_lea.hbm %s1337_s4, 32 }
 0x5c2   : > { %p1045_p5 = scmp.ne.s32.totalorder %s1337_s4, %s1044_s20  ;;  %p1050_p8 = scmp.lt.u32.totalorder %s1044_s20, %s1337_s4 }
 0x5c4   : > { %p1046_p6 = pnand %p1045_p5, %p1292_p11 }
 0x5c6   : > { %p1047_p7 = pneg %p1046_p6 }
 0x5c8   : > { %p1052_p9 = pnand %p1050_p8, %p1047_p7 }
 0x5ca   : > { %1055 = shalt.err (!%p1052_p9)
}
 0x5cb   : > { %961 = dma.vmem_to_hbm [thread:$0]  (%p1292_p11), %s772_s26, 32, %s1337_s4, [#allocation9]  }
 0x5cc   : > { %1077 = dma.done.wait (%p1292_p11), [#allocation9], 32  }
 0x5cd   : > { %1079 = vsyncadd (%p1292_p11), [#allocation9], 4294967264 }
 0x5ce PF: > { %s15_s19 = sadd.s32 1, %s1098_s19   ;;  %s1339_s15 = smov %s1086_s16 }
 0x5cf   : > { %p12_p10 = scmp.ge.s32.totalorder %s15_s19, 4   ;;  %s1340_s16 = smov %s1174_s24 }
 0x5d0   : > { %s1341_s17 = smov %s1094_s18  ;;  %s1342_s18 = smov %s1344_s21 }
 0x5d1   :  { %14 = sbr.rel (!%p12_p10) target bundleno = 3 (0x3), region = 115 }
 0x5d8   :  { %784 = vsyncpa [#allocation9], 1 }
 0x5d9   :  { %786 = vsyncpa [#allocation9 + $0x1], 1 }

</bundles_post_ra>
